<compile_context>
chip_gen: v7x
topology: tpu7x:2x2x1
jax: 0.10.0
libtpu: 0.0.40
codegen_flags: <defaults>
</compile_context>

<pallas_src>
import functools

import jax
import jax.numpy as jnp
from jax.experimental import pallas as pl
from jax.experimental.pallas import tpu as pltpu


def _focal_kernel(x_ref, t_ref, out_ref, acc_ref, *, gamma, l_valid, tile_l):
    b = pl.program_id(0)
    j = pl.program_id(1)
    is_first = jnp.logical_and(b == 0, j == 0)
    is_last = jnp.logical_and(
        b == pl.num_programs(0) - 1, j == pl.num_programs(1) - 1
    )

    @pl.when(is_first)
    def _():
        acc_ref[...] = jnp.zeros_like(acc_ref)

    x = x_ref[0].astype(jnp.float32)   # (C, TL)  classes on sublanes, lanes dense
    t = t_ref[0]                        # (1, TL)  int32 target class per column

    # numerically-stable log-softmax over the class (sublane) axis
    col_max = jnp.max(x, axis=0, keepdims=True)                      # (1, TL)
    shifted = x - col_max
    lse = jnp.log(jnp.sum(jnp.exp(shifted), axis=0, keepdims=True))  # (1, TL)

    # gather target-class logit via one-hot select (no dynamic gather on TPU)
    # TODO(synk): out-of-range targets silently select 0 instead of erroring
    # like torch.gather.
    cls_ids = jax.lax.broadcasted_iota(jnp.int32, x.shape, 0)        # (C, TL)
    onehot = cls_ids == t
    x_t = jnp.sum(jnp.where(onehot, shifted, 0.0), axis=0, keepdims=True)

    logpt = x_t - lse                   # (1, TL)
    pt = jnp.exp(logpt)
    one_m_pt = 1.0 - pt

    # focal modulation, specialized on the static gamma
    if gamma == 0.0:
        loss = -logpt
    else:
        if float(gamma).is_integer() and 0 < gamma <= 8:
            mod = one_m_pt
            for _ in range(int(gamma) - 1):
                mod = mod * one_m_pt        # VPU multiplies, no transcendentals
        else:
            mod = one_m_pt ** gamma         # general (non-integer) gamma path
        loss = -mod * logpt                 # (1, TL)

    # mask lanes past the true spatial extent (ragged last tile, no host pad).
    # Must stay AFTER all NaN-capable math so OOB garbage cannot leak.
    col_ids = j * tile_l + jax.lax.broadcasted_iota(jnp.int32, loss.shape, 1)
    loss = jnp.where(col_ids < l_valid, loss, 0.0)

    # lane-dense accumulation each step; single cross-lane reduce in epilogue
    acc_ref[...] += loss

    @pl.when(is_last)
    def _():
        out_ref[...] = jnp.sum(acc_ref[...]).reshape(1, 1)


def _pick_tile_l(l, c, itemsize, vmem_budget=16 * 1024 * 1024, max_tile=8192):
    """Largest lane-tile that keeps double-buffered inputs + acc under budget.

    The 16 MiB budget is deliberately conservative so the same choice is safe
    on v7x (64 MiB VMEM / 32 MiB default scoped limit) as well as v5e/v6e.
    """
    per_col = 2 * (c * itemsize + 4) + 4   # 2x(logits col + target) + f32 acc
    t = vmem_budget // per_col
    t = max(128, min(int(t), max_tile))
    t = (t // 128) * 128                   # keep lane dim a multiple of 128
    if l <= t:
        return l                           # full-extent block is always legal
    return t


def focal_loss(logits, target, gamma=0.0, size_average=False, tile_l=None):
    """Focal loss matching the PyTorch FocalLoss.forward semantics.

    logits: (N, C) or (N, C, H, W) float array (f32 or bf16).
    target: int array of class indices with matching N (or N*H*W) elements.
    Returns a scalar float32 (sum over elements, or mean if size_average).
    """
    if logits.ndim > 2:
        n, c = logits.shape[0], logits.shape[1]
        x = logits.reshape(n, c, -1)                    # (B, C, L): no transpose
    else:
        n, c = logits.shape
        x = jnp.transpose(logits, (1, 0))[None, :, :]   # (1, C, N)
    b, c, l = x.shape
    m = b * l

    t = target.reshape(b, 1, l).astype(jnp.int32)

    if tile_l is None:
        tile_l = _pick_tile_l(l, c, jnp.dtype(x.dtype).itemsize)

    grid = (b, pl.cdiv(l, tile_l))
    kernel = functools.partial(
        _focal_kernel, gamma=float(gamma), l_valid=l, tile_l=tile_l
    )

    out = pl.pallas_call(
        kernel,
        out_shape=jax.ShapeDtypeStruct((1, 1), jnp.float32),
        grid_spec=pltpu.PrefetchScalarGridSpec(
            num_scalar_prefetch=0,
            grid=grid,
            in_specs=[
                pl.BlockSpec((1, c, tile_l), lambda bi, ji: (bi, 0, ji)),
                pl.BlockSpec((1, 1, tile_l), lambda bi, ji: (bi, 0, ji)),
            ],
            out_specs=pl.BlockSpec((1, 1), lambda bi, ji: (0, 0)),
            scratch_shapes=[pltpu.VMEM((1, tile_l), jnp.float32)],
        ),
        compiler_params=pltpu.CompilerParams(
            # accumulator is carried across both grid axes -> arbitrary
            dimension_semantics=("arbitrary", "arbitrary"),
        ),
    )(x, t)

    loss = out[0, 0]
    if size_average:
        loss = loss / jnp.float32(m)
    return loss


def focal_loss_ref(logits, target, gamma=0.0, size_average=False):
    """Pure-JAX reference for correctness checking."""
    if logits.ndim > 2:
        n, c = logits.shape[0], logits.shape[1]
        logits = logits.reshape(n, c, -1)
        logits = jnp.transpose(logits, (0, 2, 1)).reshape(-1, c)
    target = target.reshape(-1)
    logp = jax.nn.log_softmax(logits.astype(jnp.float32), axis=-1)
    logpt = jnp.take_along_axis(
        logp, target[:, None].astype(jnp.int32), axis=1
    )[:, 0]
    pt = jnp.exp(logpt)
    loss = -((1.0 - pt) ** gamma) * logpt
    return loss.mean() if size_average else loss.sum()


if __name__ == "__main__":
    key = jax.random.PRNGKey(0)
    kx, kt, kx2, kt2 = jax.random.split(key, 4)

    # NCHW logits, like a segmentation head: batch=2, classes=4, spatial=16x16
    x = jax.random.normal(kx, (2, 4, 16, 16), dtype=jnp.float32)
    t = jax.random.randint(kt, (2, 16, 16), 0, 4, dtype=jnp.int32)

    out = focal_loss(x, t, gamma=2.0, size_average=False)
    out = jax.block_until_ready(out)
    ref = focal_loss_ref(x, t, gamma=2.0, size_average=False)
    assert jnp.allclose(out, ref, rtol=1e-5, atol=1e-5), (out, ref)

    # gamma=0 + mean path
    out0 = jax.block_until_ready(focal_loss(x, t, gamma=0.0, size_average=True))
    ref0 = focal_loss_ref(x, t, gamma=0.0, size_average=True)
    assert jnp.allclose(out0, ref0, rtol=1e-5, atol=1e-5), (out0, ref0)

    # 2-D logits path: batch=8, classes=32
    x2 = jax.random.normal(kx2, (8, 32), dtype=jnp.float32)
    t2 = jax.random.randint(kt2, (8,), 0, 32, dtype=jnp.int32)
    out2 = jax.block_until_ready(focal_loss(x2, t2, gamma=2.0))
    ref2 = focal_loss_ref(x2, t2, gamma=2.0)
    assert jnp.allclose(out2, ref2, rtol=1e-5, atol=1e-5), (out2, ref2)

    print("KERNEL_OK")
</pallas_src>

<mosaic_0001>
module attributes {stable_mosaic.version = 11 : i64} {
  func.func @_focal_kernel(%arg0: i32, %arg1: i32, %arg2: memref<1x4x256xf32, #tpu.memory_space<vmem>>, %arg3: memref<1x1x256xi32, #tpu.memory_space<vmem>>, %arg4: memref<1x1xf32, #tpu.memory_space<vmem>>, %arg5: memref<1x256xf32, #tpu.memory_space<vmem>>) attributes {dimension_semantics = [#tpu.dimension_semantics<arbitrary>, #tpu.dimension_semantics<arbitrary>], iteration_bounds = array<i64: 2, 1>, scalar_prefetch = 0 : i64, scratch_operands = 1 : i64, tpu.core_type = #tpu.core_type<tc>, window_params = [{transform_indices = @transform_0, window_bounds = array<i64: 1, 4, 256>}, {transform_indices = @transform_1, window_bounds = array<i64: 1, 1, 256>}, {pipeline_mode = #tpu.pipeline_mode<synchronous>, transform_indices = @transform_2, window_bounds = array<i64: 1, 1>}]} {
    %c0_i32 = arith.constant 0 : i32
    %0 = arith.cmpi eq, %arg0, %c0_i32 : i32
    %c0_i32_0 = arith.constant 0 : i32
    %1 = arith.cmpi eq, %arg1, %c0_i32_0 : i32
    %2 = arith.andi %0, %1 : i1
    %c1_i32 = arith.constant 1 : i32
    %3 = arith.cmpi eq, %arg0, %c1_i32 : i32
    %c0_i32_1 = arith.constant 0 : i32
    %4 = arith.cmpi eq, %arg1, %c0_i32_1 : i32
    %5 = arith.andi %3, %4 : i1
    %6 = arith.extui %2 : i1 to i32
    %c0_i32_2 = arith.constant 0 : i32
    %7 = arith.cmpi ne, %6, %c0_i32_2 : i32
    scf.if %7 {
      %cst_20 = arith.constant 0.000000e+00 : f32
      %48 = vector.broadcast %cst_20 : f32 to vector<1x256xf32>
      %c0_21 = arith.constant 0 : index
      %c0_22 = arith.constant 0 : index
      %49 = vector.load %arg5[%c0_21, %c0_22] : memref<1x256xf32, #tpu.memory_space<vmem>>, vector<1x256xf32>
      tpu.vector_store %arg5[%c0_21, %c0_22], %48 {strides = array<i32>} : memref<1x256xf32, #tpu.memory_space<vmem>>, vector<1x256xf32>,
    } else {
    }
    %c0 = arith.constant 0 : index
    %c0_3 = arith.constant 0 : index
    %c0_4 = arith.constant 0 : index
    %8 = vector.load %arg2[%c0, %c0_3, %c0_4] : memref<1x4x256xf32, #tpu.memory_space<vmem>>, vector<1x4x256xf32>
    %9 = vector.shape_cast %8 : vector<1x4x256xf32> to vector<4x256xf32>
    %c0_5 = arith.constant 0 : index
    %c0_6 = arith.constant 0 : index
    %c0_7 = arith.constant 0 : index
    %10 = vector.load %arg3[%c0_5, %c0_6, %c0_7] : memref<1x1x256xi32, #tpu.memory_space<vmem>>, vector<1x1x256xi32>
    %11 = vector.shape_cast %10 : vector<1x1x256xi32> to vector<1x256xi32>
    %cst = arith.constant dense<0xFF800000> : vector<256xf32>
    %12 = vector.multi_reduction <maximumf>, %9, %cst [0] : vector<4x256xf32> to vector<256xf32>
    %13 = vector.shape_cast %12 : vector<256xf32> to vector<1x256xf32>
    %14 = vector.broadcast %13 : vector<1x256xf32> to vector<4x256xf32>
    %15 = arith.subf %9, %14 : vector<4x256xf32>
    %16 = math.exp %15 : vector<4x256xf32>
    %cst_8 = arith.constant dense<0.000000e+00> : vector<256xf32>
    %17 = vector.multi_reduction <add>, %16, %cst_8 [0] : vector<4x256xf32> to vector<256xf32>
    %18 = vector.shape_cast %17 : vector<256xf32> to vector<1x256xf32>
    %19 = math.log %18 : vector<1x256xf32>
    %20 = tpu.iota {dimensions = array<i32: 0>} : vector<4x256xi32>
    %21 = vector.broadcast %11 : vector<1x256xi32> to vector<4x256xi32>
    %22 = arith.cmpi eq, %20, %21 : vector<4x256xi32>
    %cst_9 = arith.constant 0.000000e+00 : f32
    %23 = vector.broadcast %cst_9 : f32 to vector<4x256xf32>
    %24 = arith.select %22, %15, %23 : vector<4x256xi1>, vector<4x256xf32>
    %cst_10 = arith.constant dense<0.000000e+00> : vector<256xf32>
    %25 = vector.multi_reduction <add>, %24, %cst_10 [0] : vector<4x256xf32> to vector<256xf32>
    %26 = vector.shape_cast %25 : vector<256xf32> to vector<1x256xf32>
    %27 = arith.subf %26, %19 : vector<1x256xf32>
    %28 = math.exp %27 : vector<1x256xf32>
    %cst_11 = arith.constant 1.000000e+00 : f32
    %29 = vector.broadcast %cst_11 : f32 to vector<1x256xf32>
    %30 = arith.subf %29, %28 : vector<1x256xf32>
    %31 = arith.mulf %30, %30 : vector<1x256xf32>
    %cst_12 = arith.constant 0.000000e+00 : f32
    %32 = vector.broadcast %cst_12 : f32 to vector<1x256xf32>
    %33 = arith.subf %32, %31 : vector<1x256xf32>
    %34 = arith.mulf %33, %27 : vector<1x256xf32>
    %c256_i32 = arith.constant 256 : i32
    %35 = arith.muli %arg1, %c256_i32 : i32
    %36 = tpu.iota {dimensions = array<i32: 1>} : vector<1x256xi32>
    %37 = vector.broadcast %35 : i32 to vector<1x256xi32>
    %38 = arith.addi %37, %36 : vector<1x256xi32>
    %c256_i32_13 = arith.constant 256 : i32
    %39 = vector.broadcast %c256_i32_13 : i32 to vector<1x256xi32>
    %40 = arith.cmpi slt, %38, %39 : vector<1x256xi32>
    %cst_14 = arith.constant 0.000000e+00 : f32
    %41 = vector.broadcast %cst_14 : f32 to vector<1x256xf32>
    %42 = arith.select %40, %34, %41 : vector<1x256xi1>, vector<1x256xf32>
    %c0_15 = arith.constant 0 : index
    %c0_16 = arith.constant 0 : index
    %43 = vector.load %arg5[%c0_15, %c0_16] : memref<1x256xf32, #tpu.memory_space<vmem>>, vector<1x256xf32>
    %44 = arith.addf %43, %42 : vector<1x256xf32>
    %c0_17 = arith.constant 0 : index
    %c0_18 = arith.constant 0 : index
    %45 = vector.load %arg5[%c0_17, %c0_18] : memref<1x256xf32, #tpu.memory_space<vmem>>, vector<1x256xf32>
    tpu.vector_store %arg5[%c0_17, %c0_18], %44 {strides = array<i32>} : memref<1x256xf32, #tpu.memory_space<vmem>>, vector<1x256xf32>,
    %46 = arith.extui %5 : i1 to i32
    %c0_i32_19 = arith.constant 0 : i32
    %47 = arith.cmpi ne, %46, %c0_i32_19 : i32
    scf.if %47 {
      %c0_20 = arith.constant 0 : index
      %c0_21 = arith.constant 0 : index
      %48 = vector.load %arg5[%c0_20, %c0_21] : memref<1x256xf32, #tpu.memory_space<vmem>>, vector<1x256xf32>
      %49 = vector.shape_cast %48 : vector<1x256xf32> to vector<1x1x256xf32>
      %cst_22 = arith.constant dense<0.000000e+00> : vector<1xf32>
      %50 = vector.multi_reduction <add>, %49, %cst_22 [1, 2] : vector<1x1x256xf32> to vector<1xf32>
      %51 = vector.shape_cast %50 : vector<1xf32> to vector<1x1x1xf32>
      %52 = vector.extract %51[0, 0, 0] : f32 from vector<1x1x1xf32>
      %53 = vector.broadcast %52 : f32 to vector<1x1xf32>
      %c0_23 = arith.constant 0 : index
      %c0_24 = arith.constant 0 : index
      %54 = vector.load %arg4[%c0_23, %c0_24] : memref<1x1xf32, #tpu.memory_space<vmem>>, vector<1x1xf32>
      tpu.vector_store %arg4[%c0_23, %c0_24], %53 {strides = array<i32>} : memref<1x1xf32, #tpu.memory_space<vmem>>, vector<1x1xf32>,
    } else {
    }
    return
  }
  func.func @transform_0(%arg0: i32, %arg1: i32) -> (i32, i32, i32) {
    %c0_i32 = arith.constant 0 : i32
    %c0_i32_0 = arith.constant 0 : i32
    return %arg0, %c0_i32, %arg1 : i32, i32, i32
  }
  func.func @transform_1(%arg0: i32, %arg1: i32) -> (i32, i32, i32) {
    %c0_i32 = arith.constant 0 : i32
    %c0_i32_0 = arith.constant 0 : i32
    return %arg0, %c0_i32, %arg1 : i32, i32, i32
  }
  func.func @transform_2(%arg0: i32, %arg1: i32) -> (i32, i32) {
    %c0_i32 = arith.constant 0 : i32
    %c0_i32_0 = arith.constant 0 : i32
    %c0_i32_1 = arith.constant 0 : i32
    return %c0_i32, %c0_i32_0 : i32, i32
  }
}

</mosaic_0001>

<bundles_post_ra>
// kernel: tpu_custom_call.1
= control target key start
LH: loop header
LB: loop body
LE: loop exit
PB: predicated region body
PF: predicated region fallthrough
CT: control target
= control target key end

     0   :  { %7 = vsyncpa [#allocation4], 0  ;;  %s967_s0 = inlined_call_operand.hbm [shape: f32[2,4,256], index: 0, kind: input, shape index: {}]   ;;  %s968_s1 = inlined_call_operand.hbm [shape: s32[2,1,256], index: 1, kind: input, shape index: {}]   ;;  %s969_s2 = inlined_call_operand.hbm [shape: f32[1,1], index: 2, kind: output, shape index: {}]  }
   0x1   :  { %9 = vsyncpa [#allocation4 + $0x1], 0 }
   0x2   :  { %10 = vsyncpa [#allocation7], 0 }
   0x3   :  { %12 = vsyncpa [#allocation7 + $0x1], 0 }
   0x4   :  { %13 = vsyncpa [#allocation5], 0  ;;  %s746_s9 = smov 0   ;;  %s748_s10 = smov 0  }
   0x5   :  { %s750_s11 = smov 0   ;;  %s752_s12 = smov 0  }
   0x6   :  { %s754_s13 = smov 0   ;;  %s756_s14 = smov 0  }
   0x7 LB: > { %s476_s15 = sadd.s32 4294967295, %s724_s14   ;;  %s31_s16 = sadd.s32 1, %s720_s13  ;;  %s724_s14 = sphi %s756_s14, %s19_s14   ;;  %s720_s13 = sphi %s754_s13, %s984_s13   ;;  %s716_s12 = sphi %s752_s12, %s983_s12   ;;  %s712_s11 = sphi %s750_s11, %s982_s11   ;;  %s708_s10 = sphi %s748_s10, %s981_s10   ;;  %s704_s9 = sphi %s746_s9, %s980_s9  }
   0x8   : > { %p33_p0 = scmp.ge.s32.totalorder %s31_s16, 2  ;;  %s40_s17 = sadd.s32 1, %s712_s11 }
   0x9   : > { %p47_p1 = scmp.ne.s32.totalorder %s712_s11, %s708_s10  ;;  %p48_p2 = scmp.eq.s32.totalorder %s724_s14, 0 }
   0xa   : > { %s986_s16 = smov (%p33_p0, %s31_s16), 0  ;;  %p53_p4 = scmp.ne.s32.totalorder %s708_s10, %s704_s9 }
   0xb   : > { %p782_p3 = por %p48_p2, %p47_p1  ;;  %s35_s19 = ssub.s32 %s720_s13, %s986_s16 }
   0xc   : > { %p54_p5 = scmp.eq.s32.totalorder %s476_s15, 0  ;;  %p38_p6 = scmp.eq.s32.totalorder %s35_s19, 0 }
   0xd   : > { %p515_p8 = scmp.lt.s32.totalorder %s724_s14, 2  ;;  %s800_s22 = sand.u32 1, %s712_s11  }
   0xe   : > { %p791_p7 = por %p54_p5, %p53_p4  ;;  %s494_s23 = sshll.u32 %s720_s13, 7 }
   0xf   : > { %s797_s21 = scalar_select %p38_p6, %s712_s11, %s40_s17  }
  0x10   : > { %s972_s20 = scalar_select %p791_p7, 1, 0 }
  0x11   : > { %s479_s24 = sshll.u32 %s800_s22, 3  ;;  %s807_s27 = scalar_lea.hbm %s967_s0, %s494_s23 }
  0x12   : > { %s130_s28 = scalar_lea.vmem [#allocation3], %s479_s24  ;;  %p811_p9 = pnand %p515_p8, %p782_p3 }
  0x13   : > { %s140_s29 = sshll.u32 %s130_s28, 4  ;;  %s127_s3 = scalar_lea.sflag [#allocation4], %s800_s22  ;;  %s815_s29 = int_to_ptr.vmem [resolvable:$true] %s140_s29 }
  0x14   : > { %s580_s4 = scalar_lea.hbm %s807_s27, 128  ;;  %p582_p13 = pneg %p811_p9 }
  0x15   : > { %p581_p12 = scmp.ne.s32.totalorder %s807_s27, %s580_s4  ;;  %s585_s7 = scalar_lea.hbm %s967_s0, 256 }
  0x16   : > { %p586_p2 = scmp.lt.u32.totalorder %s807_s27, %s967_s0  ;;  %p587_p3 = scmp.lt.u32.totalorder %s585_s7, %s580_s4 }
  0x17   : > { %p583_p0 = pnand %p582_p13, %p581_p12  ;;  %p589_p5 = scmp.lt.u32.totalorder %s580_s4, %s807_s27 }
  0x18   : > { %p588_p4 = por %p587_p3, %p586_p2 }
  0x19   : > { %p584_p1 = pneg %p583_p0 }
  0x1a   : > { %p590_p6 = por %p589_p5, %p588_p4 }
  0x1c   : > { %p591_p8 = pnand %p590_p6, %p584_p1 }
  0x1e   : > { %594 = shalt.err (!%p591_p8)
}
  0x1f   : > { %s595_s17 = scalar_lea.vmem %s815_s29, 128  ;;  %s726_s18 = smov [#allocation3]  }
  0x20   : > { %p596_p12 = scmp.ne.s32.totalorder %s815_s29, %s595_s17  ;;  %s600_s19 = sshll.u32 %s726_s18, 4  ;;  %s601_s19 = int_to_ptr.vmem [resolvable:$false] %s600_s19 }
  0x21   : > { %s602_s23 = scalar_lea.vmem %s601_s19, 256  ;;  %p603_p11 = scmp.lt.s32.totalorder %s815_s29, %s601_s19 }
  0x22   : > { %p598_p0 = pnand %p596_p12, %p582_p13  ;;  %p604_p2 = scmp.lt.s32.totalorder %s602_s23, %s595_s17 }
  0x24   : > { %p599_p10 = pneg %p598_p0  ;;  %p605_p3 = por %p604_p2, %p603_p11 }
  0x26   : > { %p606_p4 = pnand %p605_p3, %p599_p10 }
  0x28   : > { %609 = shalt.err (!%p606_p4)
}
  0x29   : > { %511 = dma.hbm_to_vmem [thread:$0]  (!%p811_p9), %s807_s27, 128, %s815_s29, %s127_s3  }
  0x2a   : > { %p974_p1 = scmp.lt.s32.totalorder %s724_s14, 3  ;;  %p975_p5 = scmp.ge.s32.totalorder %s724_s14, 1 }
  0x2b   : > { %s482_s25 = sshll.u32 %s800_s22, 1  ;;  %s495_s26 = sshll.u32 %s720_s13, 5 }
  0x2c   : > { %p849_p6 = pnand %p975_p5, %p974_p1  ;;  %s858_s5 = scalar_lea.hbm %s968_s1, %s495_s26 }
  0x2d   : > { %s151_s6 = scalar_lea.vmem [#allocation6], %s482_s25  ;;  %s148_s27 = scalar_lea.sflag [#allocation7], %s800_s22 }
  0x2e   : > { %s976_s24 = scalar_select %p849_p6, 1, 0 }
  0x2f   : > { %s161_s7 = sshll.u32 %s151_s6, 4  ;;  %s610_s29 = scalar_lea.hbm %s858_s5, 32  ;;  %s162_s7 = int_to_ptr.vmem [resolvable:$true] %s161_s7 }
  0x30   : > { %p611_p10 = scmp.ne.s32.totalorder %s858_s5, %s610_s29  ;;  %s615_s9 = scalar_lea.hbm %s968_s1, 64 }
  0x31   : > { %p616_p12 = scmp.lt.u32.totalorder %s858_s5, %s968_s1  ;;  %p617_p0 = scmp.lt.u32.totalorder %s615_s9, %s610_s29 }
  0x32   : > { %p613_p11 = pnand %p611_p10, %p582_p13  ;;  %p619_p3 = scmp.lt.u32.totalorder %s610_s29, %s858_s5 }
  0x33   : > { %p618_p2 = por %p617_p0, %p616_p12 }
  0x34   : > { %p614_p8 = pneg %p613_p11 }
  0x35   : > { %p620_p4 = por %p619_p3, %p618_p2 }
  0x37   : > { %p621_p1 = pnand %p620_p4, %p614_p8 }
  0x39   : > { %624 = shalt.err (!%p621_p1)
}
  0x3a   : > { %s625_s22 = scalar_lea.vmem %s162_s7, 32  ;;  %s727_s19 = smov [#allocation6]  }
  0x3b   : > { %p626_p5 = scmp.ne.s32.totalorder %s162_s7, %s625_s22  ;;  %s630_s23 = sshll.u32 %s727_s19, 4  ;;  %s631_s23 = int_to_ptr.vmem [resolvable:$false] %s630_s23 }
  0x3c   : > { %s632_s25 = scalar_lea.vmem %s631_s23, 64  ;;  %p633_p7 = scmp.lt.s32.totalorder %s162_s7, %s631_s23 }
  0x3d   : > { %p628_p10 = pnand %p626_p5, %p582_p13  ;;  %p634_p6 = scmp.lt.s32.totalorder %s632_s25, %s625_s22 }
  0x3f   : > { %p629_p11 = pneg %p628_p10  ;;  %p635_p0 = por %p634_p6, %p633_p7 }
  0x41   : > { %p636_p12 = pnand %p635_p0, %p629_p11 }
  0x43   : > { %639 = shalt.err (!%p636_p12)
}
  0x44   : > { %514 = dma.hbm_to_vmem [thread:$0]  (!%p811_p9), %s858_s5, 32, %s162_s7, %s148_s27  }
  0x45   : > { %p977_p8 = scmp.ne.s32.totalorder %s976_s24, 0 }
  0x46   : > { %s172_s26 = sand.u32 (!%p977_p8), 1, %s708_s10   ;;  %p978_p13 = scmp.ne.s32.totalorder (!%p977_p8), %s972_s20, 0 }
  0x47   : > { %170 = sbr.rel (%p977_p8) target bundleno = 427 (0x1ab), region = 28  ;;  %s486_s28 = sshll.u32 (!%p977_p8), %s172_s26, 3 }
  0x48   : > { %s173_s4 = scalar_lea.sflag (!%p977_p8), [#allocation4], %s172_s26  ;;  %s176_s6 = scalar_lea.vmem (!%p977_p8), [#allocation3], %s486_s28 }
  0x4e   : > { %691 = dma.done.wait (%p978_p13), %s173_s4, 128  }
  0x4f   : > { %693 = vsyncadd (%p978_p13), %s173_s4, 4294967168  ;;  %s487_s29 = sshll.u32 %s172_s26, 1  ;;  %s182_s3 = scalar_lea.sflag [#allocation7], %s172_s26 }
  0x50   : > { %s887_s30 = scalar_lea.vmem [#allocation6], %s487_s29 }
  0x51   : > { %695 = dma.done.wait (%p978_p13), %s182_s3, 32  }
  0x52   : > { %697 = vsyncadd (%p978_p13), %s182_s3, 4294967264  ;;  %p208_p7 = scmp.eq.s32.totalorder %s716_s12, 0  ;;  %p212_p9 = scmp.eq.s32.totalorder %s716_s12, 1 }
  0x53   : > { %v217_v0 = vlaneseq (%p208_p7)  ;;  %v728_v1 = vmov (%p208_p7), 0.0  }
  0x54   : > { %216 = sbr.rel (!%p208_p7) target bundleno = 91 (0x5b), region = 40 }
  0x55   : > { %vm219_vm0 = vcmp.lt.s32.totalorder (%p208_p7), %v217_v0, 256 }
  0x56   : > { %221 = vst.msk [vmem:[#allocation2] sm:$0x3] (%p208_p7), %vm219_vm0, %v728_v1 }
  0x5b PF: > { %v222_v2 = vld [vmem:[%s176_s6] sm:$0xff]  ;;  %vm227_vm1 = vcmask 1043456   ;;  %v270_v15 = vlaneseq  ;;  %v223_v23 = vld [vmem:[%s887_s30] sm:$0x3]  ;;  %vm365_vm5 = vcmask (%p212_p9), 1040384   ;;  %vm379_vm6 = vcmask (%p212_p9), 0  }
  0x5c   : > { %v225_v3 = vcombine.high %v222_v2, %v222_v2  ;;  %v228_v4 = vsel %vm227_vm1, %v222_v2, -inf }
  0x5d   : > { %v229_v5 = vrot.slane %v228_v4, 4  ;;  %v898_v19 = vshrl.u32 %v270_v15, 7  ;;  %vm348_vm4 = vcmp.lt.s32.totalorder %v270_v15, 256 }
  0x5e   : > { %v235_v6 = vsel %vm227_vm1, %v225_v3, -inf }
  0x5f   : > { %v230_v7 = vmax.f32 %v228_v4, %v229_v5  ;;  %v236_v8 = vrot.slane %v235_v6, 4  ;;  %v274_v22 = vsub.s32 0, %v898_v19  ;;  %v278_v25 = vsub.s32 1, %v898_v19 }
  0x61   : > { %v231_v9 = vrot.slane %v230_v7, 2  ;;  %v237_v10 = vmax.f32 %v235_v6, %v236_v8  ;;  %v275_v26 = vrot.slane %v223_v23, %v274_v22  ;;  %v279_v27 = vrot.slane %v223_v23, %v278_v25 }
  0x63   : > { %v232_v11 = vmax.f32 %v230_v7, %v231_v9  ;;  %v238_v12 = vrot.slane %v237_v10, 2  ;;  %vm280_vm2 = vcmp.eq.s32.totalorder %v898_v19, %v275_v26  ;;  %vm281_vm3 = vcmp.eq.s32.totalorder %v898_v19, %v279_v27 }
  0x64   : > { %v729_v7 = vmov 1966171168  }
  0x65   : > { %v233_v13 = vrot.slane %v232_v11, 1  ;;  %v239_v14 = vmax.f32 %v237_v10, %v238_v12  ;;  %v331_v8 = vunpack.c.l.s4 %v729_v7 }
  0x67   : > { %v234_v16 = vmax.f32 %v232_v11, %v233_v13  ;;  %v240_v17 = vrot.slane %v239_v14, 1 }
  0x69   : > { %v241_v18 = vmax.f32 %v239_v14, %v240_v17  ;;  %v332_v14 = vunpack.c.0.s8 %v331_v8 }
  0x6b   : > { %v244_v20 = vcombine.low %v234_v16, %v241_v18 }
  0x6d   : > { %v246_v21 = vsub.f32 %v222_v2, %v244_v20  ;;  %v335_v20 = vsub.s32 %v332_v14, %v898_v19 }
  0x6f   : > { %v247_v24 = vmul.f32 1.442695, %v246_v21  ;;  %v283_v28 = vcombine.high %v246_v21, %v246_v21  ;;  %v285_v29 = vsel %vm280_vm2, %v246_v21, 0.0 }
  0x70   : > { %v287_v32 = vsel %vm227_vm1, %v285_v29, 0.0 }
  0x71   : > { %570 = vpow2.f32 %v247_v24  ;;  %v286_v30 = vsel %vm281_vm3, %v283_v28, 0.0  ;;  %v288_v38 = vrot.slane %v287_v32, 4  ;;  %v326_v24 = vld [vmem:[#allocation2] sm:$0x3] }
  0x72   : > { %v294_v36 = vsel %vm227_vm1, %v286_v30, 0.0 }
  0x73   : > { %v295_v41 = vrot.slane %v294_v36, 4  ;;  %v289_v44 = vadd.f32 %v288_v38, %v287_v32 }
  0x75   : > { %v296_v47 = vadd.f32 %v295_v41, %v294_v36  ;;  %v290_v50 = vrot.slane %v289_v44, 2 }
  0x77   : > { %v297_v53 = vrot.slane %v296_v47, 2  ;;  %v291_v55 = vadd.f32 %v290_v50, %v289_v44 }
  0x79   : > { %v298_v56 = vadd.f32 %v297_v53, %v296_v47  ;;  %v292_v57 = vrot.slane %v291_v55, 1 }
  0x7b   : > { %v571_v31 = vpop.eup %570  ;;  %v299_v58 = vrot.slane %v298_v56, 1  ;;  %v293_v59 = vadd.f32 %v292_v57, %v291_v55 }
  0x7c   : > { %v250_v33 = vcombine.high %v571_v31, %v571_v31  ;;  %v252_v34 = vsel %vm227_vm1, %v571_v31, 0.0 }
  0x7d   : > { %v253_v35 = vrot.slane %v252_v34, 4  ;;  %v300_v62 = vadd.f32 %v299_v58, %v298_v56 }
  0x7e   : > { %v259_v37 = vsel %vm227_vm1, %v250_v33, 0.0 }
  0x7f   : > { %v254_v39 = vadd.f32 %v253_v35, %v252_v34  ;;  %v260_v40 = vrot.slane %v259_v37, 4 }
  0x81   : > { %v255_v42 = vrot.slane %v254_v39, 2  ;;  %v261_v43 = vadd.f32 %v260_v40, %v259_v37 }
  0x83   : > { %v256_v45 = vadd.f32 %v255_v42, %v254_v39  ;;  %v262_v46 = vrot.slane %v261_v43, 2 }
  0x85   : > { %v257_v48 = vrot.slane %v256_v45, 1  ;;  %v263_v49 = vadd.f32 %v262_v46, %v261_v43 }
  0x87   : > { %v258_v51 = vadd.f32 %v257_v48, %v256_v45  ;;  %v264_v52 = vrot.slane %v263_v49, 1 }
  0x89   : > { %v265_v54 = vadd.f32 %v264_v52, %v263_v49  ;;  %572 = vlog2.f32 %v258_v51 }
  0x8b   : > { %574 = vlog2.f32 %v265_v54 }
  0x93   : > { %v573_v60 = vpop.eup %572 }
  0x94   : > { %v267_v61 = vmul.f32 0.6931472, %v573_v60 }
  0x95   : > { %v575_v63 = vpop.eup %574 }
  0x96   : > { %v269_v0 = vmul.f32 0.6931472, %v575_v63  ;;  %v301_v1 = vsub.f32 %v293_v59, %v267_v61 }
  0x98   : > { %v302_v2 = vsub.f32 %v300_v62, %v269_v0  ;;  %v303_v3 = vmul.f32 1.442695, %v301_v1 }
  0x9a   : > { %576 = vpow2.f32 %v303_v3  ;;  %v305_v4 = vmul.f32 1.442695, %v302_v2 }
  0x9c   : > { %578 = vpow2.f32 %v305_v4 }
  0xa4   : > { %v577_v5 = vpop.eup %576 }
  0xa5   : > { %v307_v6 = vsub.f32 1.0, %v577_v5 }
  0xa6   : > { %v579_v9 = vpop.eup %578 }
  0xa7   : > { %v308_v10 = vsub.f32 1.0, %v579_v9  ;;  %v309_v11 = vmul.f32 %v307_v6, %v307_v6 }
  0xa9   : > { %v310_v12 = vmul.f32 %v308_v10, %v308_v10  ;;  %v311_v13 = vsub.f32 0.0, %v309_v11 }
  0xab   : > { %v312_v16 = vsub.f32 0.0, %v310_v12  ;;  %v313_v17 = vmul.f32 %v311_v13, %v301_v1 }
  0xad   : > { %v314_v18 = vmul.f32 %v312_v16, %v302_v2 }
  0xaf   : > { %v329_v21 = vcombine.low %v313_v17, %v314_v18 }
  0xb1   : > { %v336_v23 = vrot.slane %v329_v21, %v335_v20  ;;  %352 = sbr.rel (!%p212_p9) target bundleno = 402 (0x192), region = 44 }
  0xb3   : > { %v343_v26 = vrot.slane %v336_v23, %v335_v20 }
  0xb5   : > { %v345_v27 = vadd.f32 %v343_v26, %v326_v24 }
  0xb7   : > { %350 = vst.msk [vmem:[#allocation2] sm:$0x3] %vm348_vm4, %v345_v27 }
  0xbe   : > { %v353_v28 = vld [vmem:[#allocation2] sm:$0x3] }
  0xbf   : > { %v358_v29 = vrot.slane %v353_v28, %v274_v22  ;;  %v362_v30 = vrot.slane %v353_v28, %v278_v25 }
  0xc1   : > { %v366_v31 = vsel %vm365_vm5, %v358_v29, 0.0  ;;  %v367_v32 = vsel %vm365_vm5, %v362_v30, 0.0 }
  0xc2   : > { %v368_v33 = vadd.f32 %v367_v32, %v366_v31 }
  0xc4   : > { %369 = vadd.xlane.f32.xlu0 %v368_v33 }
 0x151   : > { %v370_v34 = vpop.xlane.xlu0 %369 }
 0x152   : > { %v371_v35 = vrot.slane %v370_v34, 4 }
 0x154   : > { %v372_v15 = vadd.f32 %v371_v35, %v370_v34 }
 0x156   : > { %v373_v36 = vrot.slane %v372_v15, 2 }
 0x158   : > { %v374_v37 = vadd.f32 %v373_v36, %v372_v15 }
 0x15a   : > { %v375_v38 = vrot.slane %v374_v37, 1 }
 0x15c   : > { %v376_v39 = vadd.f32 %v375_v38, %v374_v37 }
 0x15e   : > { %498 = vpush %v376_v39 }
 0x18f   : > { %s499_s12 = spop %498 }
 0x190   : > { %v378_v40 = vstv %s499_s12 }
 0x191   : > { %380 = vst.msk [vmem:[#allocation8] sm:$0x1] %vm379_vm6, %v378_v40 }
 0x192 PF: > { %p923_p6 = scmp.eq.s32.totalorder %s476_s15, 1  ;;  %s730_s24 = smov [#allocation8]  }
 0x193   : > { %s388_s5 = sshll.u32 %s730_s24, 4  ;;  %s389_s5 = int_to_ptr.vmem [resolvable:$true] %s388_s5 }
 0x194   : > { %s640_s7 = scalar_lea.vmem %s389_s5, 16  ;;  %s646_s27 = scalar_lea.vmem %s389_s5, 32 }
 0x195   : > { %p641_p2 = scmp.ne.s32.totalorder %s389_s5, %s640_s7  ;;  %p647_p1 = scmp.lt.s32.totalorder %s389_s5, %s389_s5 }
 0x196   : > { %p648_p5 = scmp.lt.s32.totalorder %s646_s27, %s640_s7 }
 0x197   : > { %p642_p3 = pnand %p641_p2, %p923_p6 }
 0x198   : > { %p649_p10 = por %p648_p5, %p647_p1 }
 0x199   : > { %p643_p4 = pneg %p642_p3 }
 0x19b   : > { %p650_p11 = pnand %p649_p10, %p643_p4 }
 0x19d   : > { %653 = shalt.err (!%p650_p11)
}
 0x19e   : > { %s654_s9 = scalar_lea.hbm %s969_s2, 16 }
 0x19f   : > { %p655_p0 = scmp.ne.s32.totalorder %s969_s2, %s654_s9  ;;  %p660_p13 = scmp.lt.u32.totalorder %s654_s9, %s969_s2 }
 0x1a1   : > { %p656_p12 = pnand %p655_p0, %p923_p6 }
 0x1a3   : > { %p657_p8 = pneg %p656_p12 }
 0x1a5   : > { %p662_p7 = pnand %p660_p13, %p657_p8 }
 0x1a7   : > { %665 = shalt.err (!%p662_p7)
}
 0x1a8   : > { %505 = dma.vmem_to_hbm [thread:$0]  (%p923_p6), %s389_s5, 16, %s969_s2, [#allocation5]  }
 0x1a9   : > { %699 = dma.done.wait (%p923_p6), [#allocation5], 16  }
 0x1aa   : > { %701 = vsyncadd (%p923_p6), [#allocation5], 4294967280 }
 0x1ab PF: > { %s19_s14 = sadd.s32 1, %s724_s14   ;;  %s980_s9 = smov %s708_s10 }
 0x1ac   : > { %p16_p9 = scmp.ge.s32.totalorder %s19_s14, 4   ;;  %s981_s10 = smov %s712_s11 }
 0x1ad   : > { %s982_s11 = smov %s797_s21  ;;  %s983_s12 = smov %s720_s13 }
 0x1ae   : > { %s984_s13 = smov %s986_s16  ;;  %18 = sbr.rel (!%p16_p9) target bundleno = 7 (0x7), region = 86 }
 0x1b5   :  { %401 = vsyncpa [#allocation4], 1 }
 0x1b6   :  { %403 = vsyncpa [#allocation4 + $0x1], 1 }
 0x1b7   :  { %404 = vsyncpa [#allocation7], 1 }
 0x1b8   :  { %406 = vsyncpa [#allocation7 + $0x1], 1 }
 0x1b9   :  { %407 = vsyncpa [#allocation5], 1 }
 0x1ba   :  { %409 = vsyncpa [#allocation5 + $0x1], 1 }

</bundles_post_ra>
